<compile_context>
chip_gen: v7x
topology: tpu7x:2x2x1
jax: 0.10.0
libtpu: 0.0.40
codegen_flags: <defaults>
</compile_context>

<pallas_src>
import functools
import math

import jax
import jax.numpy as jnp
from jax import lax
from jax.experimental import pallas as pl
from jax.experimental.pallas import tpu as pltpu


def _nsp_kernel(x_ref, w_ref, b_ref, o_ref, *, rc, n_full, rem):
    """One batch tile: [TB, H] @ [H, 2] + [1, 2] -> [TB, 2], chunked over rows."""
    w = w_ref[...]
    b = b_ref[...].astype(jnp.float32)

    def compute(x_chunk):
        acc = jnp.dot(x_chunk, w, preferred_element_type=jnp.float32)
        return (acc + b).astype(o_ref.dtype)

    if n_full == 1 and rem == 0:
        # Single chunk: whole tile at once (tiny tiles / tb <= row_chunk).
        o_ref[...] = compute(x_ref[...])
        return

    def body(c, carry):
        start = pl.multiple_of(c * rc, rc)
        o_ref[pl.ds(start, rc), :] = compute(x_ref[pl.ds(start, rc), :])
        return carry

    if n_full > 0:
        lax.fori_loop(0, n_full, body, 0)
    if rem > 0:
        start = n_full * rc  # static tail
        o_ref[pl.ds(start, rem), :] = compute(x_ref[pl.ds(start, rem), :])


def next_sentence_pred(x, w, b, *, target_tile_bytes=4 * 1024 * 1024, row_chunk=512):
    """x: [B, H], w: [H, 2] (transposed vs PyTorch's [2, H]), b: [2] -> logits [B, 2]."""
    B, H = x.shape
    assert w.shape == (H, 2) and b.shape == (2,)

    isz = jnp.dtype(x.dtype).itemsize
    osz = isz
    # Sublane granule: 8 rows for 32-bit, 16 for 16-bit, 32 for 8-bit dtypes.
    granule = max(8, 32 // isz)

    # ---- Batch tile from a VMEM byte budget (not a fixed row count). --------
    # Per-row VMEM cost of one pipelined buffer: X row + lane-padded (->128)
    # output row.  ~4 MiB per buffer keeps all generations near their HBM
    # roofline while the double-buffered working set stays well under the
    # v7x 64 MiB / 32 MiB-scoped VMEM budget.
    row_bytes = H * isz + 128 * osz
    tb_budget = max(granule, (target_tile_bytes // row_bytes) // granule * granule)
    tb = B if B <= tb_budget else tb_budget
    grid = (pl.cdiv(B, tb),)

    # ---- In-kernel row chunking (bounds the live [rc, 2] f32 result). -------
    if tb <= row_chunk:
        rc, n_full, rem = tb, 1, 0
    else:
        rc = max(granule, (row_chunk // granule) * granule)
        n_full, rem = divmod(tb, rc)

    # ---- VMEM limit: 2 X buffers + 2 lane-padded out buffers + W + headroom.
    x_buf = 2 * tb * H * isz
    o_buf = 2 * tb * 128 * osz
    w_buf = ((H + 7) // 8) * 8 * 128 * isz
    est = x_buf + o_buf + w_buf + (1 << 20)
    vmem_limit = int(min(max(2 * est, 16 * 1024 * 1024), 32 * 1024 * 1024))

    # Purely HBM-bound and tiny in FLOPs: tell XLA so it schedules this call
    # sensibly when it runs inside a larger graph.
    cost = pl.CostEstimate(
        flops=2 * B * H * 2 + B * 2,
        bytes_accessed=B * H * isz + H * 2 * isz + 2 * isz + B * 2 * osz,
        transcendentals=0,
    )

    b2d = b.reshape(1, 2)
    kernel = functools.partial(_nsp_kernel, rc=rc, n_full=n_full, rem=rem)

    return pl.pallas_call(
        kernel,
        out_shape=jax.ShapeDtypeStruct((B, 2), x.dtype),
        grid_spec=pltpu.PrefetchScalarGridSpec(
            num_scalar_prefetch=0,
            grid=grid,
            in_specs=[
                pl.BlockSpec((tb, H), lambda i: (i, 0)),   # X: streamed per batch tile
                pl.BlockSpec((H, 2), lambda i: (0, 0)),    # W: resident in VMEM
                pl.BlockSpec((1, 2), lambda i: (0, 0)),    # b: resident in VMEM
            ],
            out_specs=pl.BlockSpec((tb, 2), lambda i: (i, 0)),
        ),
        compiler_params=pltpu.CompilerParams(
            # Independent batch tiles -> shard across TensorCores on v7x.
            dimension_semantics=("parallel",),
            vmem_limit_bytes=vmem_limit,
        ),
        cost_estimate=cost,
    )(x, w, b2d)


if __name__ == "__main__":
    key = jax.random.PRNGKey(0)
    kx, kw, kb, kx2, kx3, kw3, kb3 = jax.random.split(key, 7)

    # --- 1) Module-sized tiny shapes: batch=8 <cls> reps, num_inputs=32. -----
    batch, num_inputs = 8, 32
    bound = 1.0 / math.sqrt(num_inputs)
    x = jax.random.normal(kx, (batch, num_inputs), dtype=jnp.float32)
    w = jax.random.uniform(kw, (num_inputs, 2), minval=-bound, maxval=bound,
                           dtype=jnp.float32)
    b = jax.random.uniform(kb, (2,), minval=-bound, maxval=bound,
                           dtype=jnp.float32)
    out = jax.block_until_ready(next_sentence_pred(x, w, b))
    ref = x @ w + b[None, :]
    assert out.shape == (batch, 2)
    assert jnp.allclose(out, ref, atol=1e-5, rtol=1e-5), "mismatch (small f32)"

    # --- 2) Large batch: tiled/pipelined path with a partial last grid tile
    #        and the in-kernel row-chunk loop (+ static tail). ----------------
    batch2 = 13200
    x2 = jax.random.normal(kx2, (batch2, num_inputs), dtype=jnp.float32)
    out2 = jax.block_until_ready(next_sentence_pred(x2, w, b))
    ref2 = x2 @ w + b[None, :]
    assert out2.shape == (batch2, 2)
    assert jnp.allclose(out2, ref2, atol=1e-4, rtol=1e-4), "mismatch (tiled f32)"

    # --- 3) bf16 activations/weights (halves HBM traffic; f32 accumulate). ---
    batch3, hidden3 = 4096, 64
    bound3 = 1.0 / math.sqrt(hidden3)
    x3 = jax.random.normal(kx3, (batch3, hidden3), dtype=jnp.float32).astype(jnp.bfloat16)
    w3 = jax.random.uniform(kw3, (hidden3, 2), minval=-bound3, maxval=bound3,
                            dtype=jnp.float32).astype(jnp.bfloat16)
    b3 = jax.random.uniform(kb3, (2,), minval=-bound3, maxval=bound3,
                            dtype=jnp.float32).astype(jnp.bfloat16)
    out3 = jax.block_until_ready(next_sentence_pred(x3, w3, b3))
    ref3 = (x3.astype(jnp.float32) @ w3.astype(jnp.float32)
            + b3.astype(jnp.float32)[None, :])
    assert out3.shape == (batch3, 2)
    assert jnp.allclose(out3.astype(jnp.float32), ref3, atol=3e-2, rtol=3e-2), \
        "mismatch (bf16)"

    print("KERNEL_OK")
</pallas_src>

<mosaic_0001>
module attributes {stable_mosaic.version = 11 : i64} {
  func.func @_nsp_kernel(%arg0: i32, %arg1: memref<8x32xf32, #tpu.memory_space<vmem>>, %arg2: memref<32x2xf32, #tpu.memory_space<vmem>>, %arg3: memref<1x2xf32, #tpu.memory_space<vmem>>, %arg4: memref<8x2xf32, #tpu.memory_space<vmem>>) attributes {dimension_semantics = [#tpu.dimension_semantics<parallel>], iteration_bounds = array<i64: 1>, scalar_prefetch = 0 : i64, scratch_operands = 0 : i64, tpu.core_type = #tpu.core_type<tc>, window_params = [{transform_indices = @transform_0, window_bounds = array<i64: 8, 32>}, {pipeline_mode = #tpu.pipeline_mode<synchronous>, transform_indices = @transform_1, window_bounds = array<i64: 32, 2>}, {pipeline_mode = #tpu.pipeline_mode<synchronous>, transform_indices = @transform_2, window_bounds = array<i64: 1, 2>}, {transform_indices = @transform_3, window_bounds = array<i64: 8, 2>}]} {
    %c0 = arith.constant 0 : index
    %c0_0 = arith.constant 0 : index
    %0 = vector.load %arg2[%c0, %c0_0] : memref<32x2xf32, #tpu.memory_space<vmem>>, vector<32x2xf32>
    %c0_1 = arith.constant 0 : index
    %c0_2 = arith.constant 0 : index
    %1 = vector.load %arg3[%c0_1, %c0_2] : memref<1x2xf32, #tpu.memory_space<vmem>>, vector<1x2xf32>
    %c0_3 = arith.constant 0 : index
    %c0_4 = arith.constant 0 : index
    %2 = vector.load %arg1[%c0_3, %c0_4] : memref<8x32xf32, #tpu.memory_space<vmem>>, vector<8x32xf32>
    %cst = arith.constant dense<0.000000e+00> : vector<8x2xf32>
    %3 = tpu.matmul %2, %0, %cst {dimension_numbers = #tpu.dot_dimension_numbers<[1], [0], [0], [1], [0, 0, 1, 1], [], []>} : vector<8x32xf32>, vector<32x2xf32>, vector<8x2xf32> -> vector<8x2xf32>
    %4 = vector.broadcast %1 : vector<1x2xf32> to vector<8x2xf32>
    %5 = arith.addf %3, %4 : vector<8x2xf32>
    %c0_5 = arith.constant 0 : index
    %c0_6 = arith.constant 0 : index
    %6 = vector.load %arg4[%c0_5, %c0_6] : memref<8x2xf32, #tpu.memory_space<vmem>>, vector<8x2xf32>
    tpu.vector_store %arg4[%c0_5, %c0_6], %5 {strides = array<i32>} : memref<8x2xf32, #tpu.memory_space<vmem>>, vector<8x2xf32>,
    return
  }
  func.func @transform_0(%arg0: i32) -> (i32, i32) {
    %c0_i32 = arith.constant 0 : i32
    %c0_i32_0 = arith.constant 0 : i32
    return %arg0, %c0_i32 : i32, i32
  }
  func.func @transform_1(%arg0: i32) -> (i32, i32) {
    %c0_i32 = arith.constant 0 : i32
    %c0_i32_0 = arith.constant 0 : i32
    %c0_i32_1 = arith.constant 0 : i32
    return %c0_i32, %c0_i32_0 : i32, i32
  }
  func.func @transform_2(%arg0: i32) -> (i32, i32) {
    %c0_i32 = arith.constant 0 : i32
    %c0_i32_0 = arith.constant 0 : i32
    %c0_i32_1 = arith.constant 0 : i32
    return %c0_i32, %c0_i32_0 : i32, i32
  }
  func.func @transform_3(%arg0: i32) -> (i32, i32) {
    %c0_i32 = arith.constant 0 : i32
    %c0_i32_0 = arith.constant 0 : i32
    return %arg0, %c0_i32 : i32, i32
  }
}

</mosaic_0001>

<bundles_post_ra>
// kernel: tpu_custom_call.1
= control target key start
LH: loop header
LB: loop body
LE: loop exit
PB: predicated region body
PF: predicated region fallthrough
CT: control target
= control target key end

     0   :  { %v133_v0 = vmov 0.0|0.0   ;;  %vm134_vm0 = vmmov 0   ;;  %v135_v4 = vmov 0.0   ;;  %vm26_vm1 = vcmask 261120   ;;  %s177_s1 = inlined_call_operand.vmem [shape: f32[32,2], index: 1, kind: input, shape index: {}]   ;;  %s178_s0 = inlined_call_operand.vmem [shape: f32[8,32], index: 0, kind: input, shape index: {}]   ;;  %s179_s2 = inlined_call_operand.vmem [shape: f32[1,2], index: 2, kind: input, shape index: {}]   ;;  %s180_s3 = inlined_call_operand.vmem [shape: f32[8,2], index: 3, kind: output, shape index: {}]  }
   0x1   :  { %124 = vmatprep.subr.bf16.mxu0 %v133_v0  ;;  %v14_v1 = vld [vmem:[%s177_s1] sm:$0xff]  ;;  %v15_v2 = vld [vmem:[%s177_s1 + $0x8] sm:$0xff]  ;;  %v16_v3 = vld [vmem:[%s177_s1 + $0x10] sm:$0xff]  ;;  %121 = vmatprep.mubr.msk.f32.mxu0 %vm134_vm0, %v135_v4  ;;  %vm100_vm2 = vcmask 15360  }
   0x2   :  { %v125_v5 = vpack.c.bf16 %v15_v2, %v14_v1  ;;  %v17_v6 = vld [vmem:[%s177_s1 + $0x18] sm:$0xff]  ;;  %v19_v8 = vld [vmem:[%s178_s0] sm:$0xff] }
   0x3   :  { %v128_v7 = vpack.c.bf16 %v17_v6, %v16_v3  ;;  %v106_v9 = vld [vmem:[%s179_s2] ss:$0 sm:$0xff] }
   0x4   :  { %126 = vmatpush3.bf16.msra.mxu0 %v125_v5 }
   0x5   :  { %127 = vmatprep.subr.bf16.mxu0 %v133_v0 }
   0x8   :  { %129 = vmatpush3.bf16.msra.mxu0 %v128_v7 }
   0xb   :  { %122 = vmatmul.mubr.msk.f32.vlgmr.msra.gmra.mrb[0].mxu0 %vm26_vm1, %v19_v8 }
  0xde   :  { %v96_v10 = vpop.f32.mrb[0].mxu0 }
  0xdf   :  { %v97_v11 = vadd.f32 %v106_v9, %v96_v10  ;;  %v123_v12 = vpop.f32.mrb[1].mxu0 }
  0xe1   :  { %101 = vst.msk [vmem:[%s180_s3] sm:$0xff] %vm100_vm2, %v97_v11 }

</bundles_post_ra>
